<compile_context>
chip_gen: v7x
topology: tpu7x:2x2x1
jax: 0.10.0
libtpu: 0.0.40
codegen_flags: <defaults>
</compile_context>

<pallas_src>
import jax
import jax.numpy as jnp
from jax.experimental import pallas as pl
from jax.experimental.pallas import tpu as pltpu


def _mtl_loss_kernel(sig_ref, loss_ref, out_ref):
    """sig_ref / loss_ref: (1, n) f32 VMEM blocks (full arrays, true logical shape).
    out_ref: (1, 1) f32 SMEM scalar output."""
    sig = sig_ref[...]        # (1, n) f32 — sigma parameters
    losses = loss_ref[...]    # (1, n) f32 — slot-aligned losses (missing keys = 0)

    # Numerically-stable softmax-weighted sum over the n logical lanes.
    # The blocks carry their true (1, n) shape, so the lane reductions cover exactly
    # the live entries — no explicit validity mask / -inf fill needed.
    m = jnp.max(sig, axis=-1, keepdims=True)            # (1, 1)
    e = jnp.exp(sig - m)                                 # (1, n)
    den = jnp.sum(e, axis=-1, keepdims=True)             # (1, 1)
    num = jnp.sum(e * losses, axis=-1, keepdims=True)    # (1, 1)
    out_ref[0, 0] = (num / den)[0, 0]                    # scalar store to SMEM


def mtl_loss_pallas(sigmas, losses_aligned):
    """sigmas: (n,) f32 parameter; losses_aligned: (n,) f32 where slot lw[k] holds
    loss_dict[k] (missing task keys already folded in as literal 0)."""
    n = int(sigmas.shape[0])
    if n == 0:
        return jnp.float32(0.0)

    sig2d = sigmas.astype(jnp.float32).reshape(1, n)
    loss2d = losses_aligned.astype(jnp.float32).reshape(1, n)

    out = pl.pallas_call(
        _mtl_loss_kernel,
        out_shape=jax.ShapeDtypeStruct((1, 1), jnp.float32),
        grid=(),
        in_specs=[pl.BlockSpec((1, n), lambda: (0, 0)),
                  pl.BlockSpec((1, n), lambda: (0, 0))],
        out_specs=pl.BlockSpec(memory_space=pltpu.MemorySpace.SMEM),
    )(sig2d, loss2d)
    return out[0, 0]


class MTLLossPallas:
    """Mirror of the PyTorch MTL_loss module, with a Pallas forward."""

    def __init__(self, supervised, ssl_args, loss_weights):
        ssl_args = dict(ssl_args)
        ssl_args['seg'] = True
        self.lw = {}
        i = 0
        for k, v in loss_weights.items():
            if v == 'auto' and ssl_args.get(k, False):
                self.lw[k] = i
                i += 1
        # nn.Parameter(torch.ones(i) / i) — deterministic init
        self.sigmas = (jnp.ones((i,), jnp.float32) / float(i)) if i > 0 else jnp.zeros((0,), jnp.float32)
        self.loss_weights = loss_weights

    def forward(self, loss_dict):
        n = int(self.sigmas.shape[0])
        if n == 0:
            return jnp.float32(0.0)
        # Trace-time glue: dict membership is static Python, so missing slots are
        # literal zeros and alignment is one jnp.stack of n scalars.
        slot_vals = [jnp.float32(0.0)] * n
        for k, v in loss_dict.items():
            if k in self.lw:
                slot_vals[self.lw[k]] = jnp.asarray(v, jnp.float32)
        losses_aligned = jnp.stack(slot_vals)
        return mtl_loss_pallas(self.sigmas, losses_aligned)


if __name__ == "__main__":
    # config mimicking the module's __init__ arguments
    supervised = {}
    ssl_args = {'seg': False, 'rot': True, 'color': False, 'jigsaw': True}
    loss_weights = {'seg': 'auto', 'rot': 'auto', 'color': 1.0, 'jigsaw': 'auto'}

    module = MTLLossPallas(supervised, ssl_args, loss_weights)

    # deterministic per-task scalar losses
    key = jax.random.PRNGKey(0)
    vals = jax.random.uniform(key, (4,), jnp.float32, minval=0.1, maxval=2.0)
    loss_dict = {'seg': vals[0], 'rot': vals[1], 'color': vals[2], 'jigsaw': vals[3]}

    out = module.forward(loss_dict)
    out = jax.block_until_ready(out)

    # plain-JAX reference
    w = jax.nn.softmax(module.sigmas)
    ref = sum(w[module.lw[k]] * loss_dict[k] for k in loss_dict if k in module.lw)
    assert jnp.allclose(out, ref, rtol=1e-5, atol=1e-6), (out, ref)

    print("KERNEL_OK")
</pallas_src>

<mosaic_0001>
module attributes {stable_mosaic.version = 11 : i64} {
  func.func @_mtl_loss_kernel(%arg0: memref<1x3xf32, #tpu.memory_space<vmem>>, %arg1: memref<1x3xf32, #tpu.memory_space<vmem>>, %arg2: memref<1x1xf32, #tpu.memory_space<smem>>) attributes {dimension_semantics = [], scalar_prefetch = 0 : i64, scratch_operands = 0 : i64, tpu.core_type = #tpu.core_type<tc>} {
    %c0 = arith.constant 0 : index
    %c0_0 = arith.constant 0 : index
    %0 = vector.load %arg0[%c0, %c0_0] : memref<1x3xf32, #tpu.memory_space<vmem>>, vector<1x3xf32>
    %c0_1 = arith.constant 0 : index
    %c0_2 = arith.constant 0 : index
    %1 = vector.load %arg1[%c0_1, %c0_2] : memref<1x3xf32, #tpu.memory_space<vmem>>, vector<1x3xf32>
    %cst = arith.constant dense<0xFF800000> : vector<1xf32>
    %2 = vector.multi_reduction <maximumf>, %0, %cst [1] : vector<1x3xf32> to vector<1xf32>
    %3 = vector.shape_cast %2 : vector<1xf32> to vector<1x1xf32>
    %4 = vector.broadcast %3 : vector<1x1xf32> to vector<1x3xf32>
    %5 = arith.subf %0, %4 : vector<1x3xf32>
    %6 = math.exp %5 : vector<1x3xf32>
    %cst_3 = arith.constant dense<0.000000e+00> : vector<1xf32>
    %7 = vector.multi_reduction <add>, %6, %cst_3 [1] : vector<1x3xf32> to vector<1xf32>
    %8 = vector.shape_cast %7 : vector<1xf32> to vector<1x1xf32>
    %9 = arith.mulf %6, %1 : vector<1x3xf32>
    %cst_4 = arith.constant dense<0.000000e+00> : vector<1xf32>
    %10 = vector.multi_reduction <add>, %9, %cst_4 [1] : vector<1x3xf32> to vector<1xf32>
    %11 = vector.shape_cast %10 : vector<1xf32> to vector<1x1xf32>
    %12 = arith.divf %11, %8 : vector<1x1xf32>
    %13 = vector.extract %12[0, 0] : f32 from vector<1x1xf32>
    %c0_5 = arith.constant 0 : index
    %c0_6 = arith.constant 0 : index
    %14 = memref.load %arg2[%c0_5, %c0_6] : memref<1x1xf32, #tpu.memory_space<smem>>
    memref.store %13, %arg2[%c0_5, %c0_6] : memref<1x1xf32, #tpu.memory_space<smem>>
    return
  }
}

</mosaic_0001>

<bundles_post_ra>
// kernel: tpu_custom_call.1
= control target key start
LH: loop header
LB: loop body
LE: loop exit
PB: predicated region body
PF: predicated region fallthrough
CT: control target
= control target key end

     0   :  { %7 = vsyncpa [#allocation3], 0  ;;  %s147_s0 = inlined_call_operand.hbm [shape: f32[1,3], index: 0, kind: input, shape index: {}]   ;;  %s148_s1 = inlined_call_operand.vmem [shape: f32[1,3], index: 1, kind: input, shape index: {}]   ;;  %s149_s2 = inlined_call_operand.hbm [shape: f32[1,1], index: 2, kind: output, shape index: {}]  }
   0x1   :  { %8 = vsyncpa [#allocation4], 0  ;;  %s103_s9 = smov [#allocation2]   ;;  %s67_s13 = scalar_lea.hbm %s147_s0, 16 }
   0x2   :  { %s15_s10 = sshll.u32 %s103_s9, 4  ;;  %p68_p0 = scmp.ne.s32.totalorder %s147_s0, %s67_s13  ;;  %s16_s10 = int_to_ptr.vmem [resolvable:$true] %s15_s10 }
   0x3   :  { %p71_p1 = scmp.lt.u32.totalorder %s67_s13, %s147_s0 }
   0x5   :  { %p73_p2 = pnand %p71_p1, %p68_p0 }
   0x7   :  { %76 = shalt.err (!%p73_p2)
}
   0x8   :  { %s77_s18 = scalar_lea.vmem %s16_s10, 16  ;;  %s81_s19 = scalar_lea.vmem %s16_s10, 32 }
   0x9   :  { %p78_p3 = scmp.ne.s32.totalorder %s16_s10, %s77_s18  ;;  %p82_p4 = scmp.lt.s32.totalorder %s16_s10, %s16_s10 }
   0xa   :  { %p83_p5 = scmp.lt.s32.totalorder %s81_s19, %s77_s18 }
   0xc   :  { %p84_p6 = por %p83_p5, %p82_p4 }
   0xe   :  { %p85_p7 = pnand %p84_p6, %p78_p3 }
  0x10   :  { %88 = shalt.err (!%p85_p7)
}
  0x11   :  { %18 = dma.hbm_to_vmem [thread:$0]  %s147_s0, 16, %s16_s10, [#allocation3]  }
  0x12   :  { %99 = dma.done.wait [#allocation3], 16  }
  0x13   :  { %100 = vsyncadd [#allocation3], 4294967280  ;;  %vm26_vm0 = vcmask 16384   ;;  %v24_v0 = vld [vmem:[#allocation2] sm:$0x1]  ;;  %s89_s26 = scalar_lea.hbm %s149_s2, 16 }
  0x14   :  { %v27_v1 = vsel %vm26_vm0, %v24_v0, -inf  ;;  %v25_v5 = vld [vmem:[%s148_s1] sm:$0x1]  ;;  %p90_p8 = scmp.ne.s32.totalorder %s149_s2, %s89_s26  ;;  %p93_p9 = scmp.lt.u32.totalorder %s89_s26, %s149_s2 }
  0x15   :  { %28 = vmax.xlane.f32.xlu0 %v27_v1 }
  0x16   :  { %p95_p10 = pnand %p93_p9, %p90_p8 }
  0xa2   :  { %v29_v2 = vpop.xlane.xlu0 %28 }
  0xa3   :  { %v30_v3 = vsub.f32 %v24_v0, %v29_v2 }
  0xa5   :  { %v31_v4 = vmul.f32 1.442695, %v30_v3 }
  0xa7   :  { %63 = vpow2.f32 %v31_v4 }
  0xb1   :  { %v64_v6 = vpop.eup %63 }
  0xb2   :  { %v33_v7 = vsel %vm26_vm0, %v64_v6, 0.0  ;;  %v36_v8 = vmul.f32 %v64_v6, %v25_v5 }
  0xb3   :  { %34 = vadd.xlane.f32.xlu0 %v33_v7 }
  0xb4   :  { %v37_v9 = vsel %vm26_vm0, %v36_v8, 0.0 }
  0xb5   :  { %38 = vadd.xlane.f32.xlu1 %v37_v9 }
 0x140   :  { %v35_v10 = vpop.xlane.xlu0 %34 }
 0x141   :  { %65 = vrcp.f32 %v35_v10 }
 0x142   :  { %v39_v12 = vpop.xlane.xlu1 %38 }
 0x14b   :  { %v66_v11 = vpop.eup %65 }
 0x14c   :  { %v41_v13 = vmul.f32 %v66_v11, %v39_v12 }
 0x14e   :  { %59 = vpush %v41_v13 }
 0x17f   :  { %s60_s0 = spop %59 }
 0x180   :  { %44 = sst [smem:[#allocation5]] %s60_s0 }
 0x181   :  { %98 = shalt.err (!%p95_p10)
}
 0x182   :  { %s104_s30 = smov [#allocation5]  }
 0x183   :  { %52 = dma.smem_to_hbm %s104_s30, 16, %s149_s2, [#allocation4]  }
 0x184   :  { %101 = dma.done.wait [#allocation4], 16  }
 0x185   :  { %102 = vsyncadd [#allocation4], 4294967280 }
 0x186   :  { %56 = sfence }
 0x187   :  { %57 = vsyncpa [#allocation3], 1 }
 0x188   :  { %58 = vsyncpa [#allocation4], 1 }

</bundles_post_ra>
